<compile_context>
chip_gen: v6e
topology: v6e:2x2x1
jax: 0.10.0
libtpu: 0.0.40
codegen_flags: <defaults>
</compile_context>

<pallas_src>
import functools

import jax
import jax.numpy as jnp
import numpy as np
from jax.experimental import pallas as pl
from jax.experimental.pallas import tpu as pltpu

_SUBLANE = 8


def _default_fuse_fc():
    # v6e/v7x MXU is 256 wide -> appending the O output columns to the recurrent matmul
    # is free.  On v5e (128-wide MXU) 4H = 128 already fills the pass, so fusing would
    # add a second MXU pass to every serial step -- keep it off there (and on unknown
    # / older chips).
    try:
        kind = jax.devices()[0].device_kind.lower()
    except Exception:
        return False
    return ("v6" in kind) or ("v7" in kind)


def _lstm_rnn_kernel(x_ref, w_ih_t_ref, b_g_ref, w_rec_t_ref, w_fc_t_ref, b_fc_ref,
                     y_ref, *, seq_len, batch_p, hidden, out_dim, fuse_fc):
    S, B, H, O = seq_len, batch_p, hidden, out_dim

    # (1) Hoisted input projection for ALL timesteps at once (off the serial chain):
    #     (S*B, I) @ (I, 4H) + b -> (S*B, 4H); gate column order [i, f, o, g] with the
    #     g columns pre-scaled by 2 (so tanh(x) == 2*sigmoid(2x) - 1 below).
    xw = (jnp.dot(x_ref[...], w_ih_t_ref[...], preferred_element_type=jnp.float32)
          + b_g_ref[...])

    # Loop-invariant weights, loaded once (already transposed / fused in the wrapper).
    w_rec = w_rec_t_ref[...]     # (H, 4H) or (H, 4H + O) when the FC is fused in
    w_fc_t = w_fc_t_ref[...]     # (H, O)

    # (2) Serial recurrence, fully unrolled (S small & static) so the LLO scheduler sees
    #     across steps.  All slices are static and sublane-aligned (B is a multiple of 8).
    h_t = jnp.zeros((B, H), jnp.float32)
    c_t = jnp.zeros((B, H), jnp.float32)
    h_hist = []      # vreg-resident h history (un-fused path)
    y_parts = []     # vreg-resident FC partials (fused path)

    for t in range(S):
        rec = jnp.dot(h_t, w_rec, preferred_element_type=jnp.float32)
        if fuse_fc:
            gates = xw[t * B:(t + 1) * B, :] + rec[:, :4 * H]       # (B, 4H)
            if t > 0:
                y_parts.append(rec[:, 4 * H:])   # h_t @ W_fc^T == step-t output (pre-bias)
        else:
            gates = xw[t * B:(t + 1) * B, :] + rec                  # (B, 4H)

        # ONE sigmoid over the whole slab (single EUP dispatch per step for the gates).
        # Gate extraction below is 32-lane sub-slices of the 128-lane gates vreg; the
        # XLU shifts are expected to hide under MXU/EUP latency (see header comment).
        sig = jax.nn.sigmoid(gates)
        i_g = sig[:, 0 * H:1 * H]
        f_g = sig[:, 1 * H:2 * H]
        o_g = sig[:, 2 * H:3 * H]
        g_g = 2.0 * sig[:, 3 * H:4 * H] - 1.0    # == tanh of the unscaled g preactivation

        c_t = f_g * c_t + i_g * g_g
        h_t = o_g * jnp.tanh(c_t)

        if not fuse_fc:
            h_hist.append(h_t)                   # stays in vregs; no VMEM store

    # (3) forwardCalculation epilogue.
    if fuse_fc:
        # Only the last step's FC is still missing (the loop produced y_1..y_{S-1}).
        y_parts.append(jnp.dot(h_t, w_fc_t, preferred_element_type=jnp.float32))
        y = jnp.concatenate(y_parts, axis=0) + b_fc_ref[...]
    else:
        h_all = jnp.concatenate(h_hist, axis=0)                     # (S*B, H), in vregs
        y = (jnp.dot(h_all, w_fc_t, preferred_element_type=jnp.float32)
             + b_fc_ref[...])
    y_ref[...] = y.astype(y_ref.dtype)


def prepare_lstm_params(w_ih, w_hh, b_ih, b_hh, w_fc, b_fc):
    """One-time (off the hot path) weight prep: gate reorder [i,f,g,o] -> [i,f,o,g],
    pre-scale the g block by 2 (tanh(x) = 2*sigmoid(2x) - 1), transpose for the MXU,
    and pre-append W_fc^T to W_hh^T for the fused-FC (v6e/v7x) path."""
    H = w_hh.shape[1]
    O = w_fc.shape[0]

    def reorder_scale(m):
        m = m.astype(jnp.float32)
        return jnp.concatenate([m[0:2 * H], m[3 * H:4 * H], 2.0 * m[2 * H:3 * H]],
                               axis=0)

    w_ih_t = reorder_scale(w_ih).T                           # (I, 4H)
    w_hh_t = reorder_scale(w_hh).T                           # (H, 4H)
    w_fc_t = w_fc.T.astype(jnp.float32)                      # (H, O)
    return {
        "w_ih_t": w_ih_t,
        "w_hh_t": w_hh_t,
        "w_rec_t": jnp.concatenate([w_hh_t, w_fc_t], axis=1),  # (H, 4H + O), fused path
        "w_fc_t": w_fc_t,
        "b_g": reorder_scale(b_ih + b_hh).reshape(1, 4 * H),
        "b_out": b_fc.reshape(1, O).astype(jnp.float32),
    }


def lstm_rnn_forward(x, params, *, fuse_fc=None):
    """x: (S, B, I) float32; params from prepare_lstm_params(). Returns (S, B, O)."""
    S, B, I = x.shape
    H = params["w_hh_t"].shape[0]
    O = params["w_fc_t"].shape[1]
    if fuse_fc is None:
        fuse_fc = _default_fuse_fc()

    w_rec = params["w_rec_t"] if fuse_fc else params["w_hh_t"]
    rec_cols = 4 * H + O if fuse_fc else 4 * H

    # Pad batch to the 8-sublane width: padded rows are independent junk (no cross-batch
    # mixing in an LSTM) and are sliced off below; every per-step tile becomes aligned.
    Bp = max(_SUBLANE, -(-B // _SUBLANE) * _SUBLANE)
    if Bp != B:
        x = jnp.concatenate([x, jnp.zeros((S, Bp - B, I), x.dtype)], axis=1)
    x2d = x.reshape(S * Bp, I).astype(jnp.float32)

    kernel = functools.partial(_lstm_rnn_kernel, seq_len=S, batch_p=Bp, hidden=H,
                               out_dim=O, fuse_fc=fuse_fc)

    # TODO(synk): for production-sized S/B/H, tile x / xw / the epilogue over S-chunks
    # with a pipelined grid axis (carry h/c in scratch) instead of keeping everything
    # VMEM-resident, and set vmem_limit_bytes explicitly (v7x has 64 MiB physical VMEM).
    y2d = pl.pallas_call(
        kernel,
        out_shape=jax.ShapeDtypeStruct((S * Bp, O), jnp.float32),
        grid_spec=pltpu.PrefetchScalarGridSpec(
            num_scalar_prefetch=0,
            grid=(1,),                                         # single sequential point
            in_specs=[
                pl.BlockSpec((S * Bp, I), lambda i: (0, 0)),   # x, flattened over time
                pl.BlockSpec((I, 4 * H), lambda i: (0, 0)),    # W_ih^T (reordered, g*2)
                pl.BlockSpec((1, 4 * H), lambda i: (0, 0)),    # b_ih + b_hh (reordered, g*2)
                pl.BlockSpec((H, rec_cols), lambda i: (0, 0)),  # W_hh^T [| W_fc^T if fused]
                pl.BlockSpec((H, O), lambda i: (0, 0)),        # W_fc^T
                pl.BlockSpec((1, O), lambda i: (0, 0)),        # b_fc
            ],
            out_specs=pl.BlockSpec((S * Bp, O), lambda i: (0, 0)),
        ),
        compiler_params=pltpu.CompilerParams(
            dimension_semantics=("arbitrary",),
        ),
    )(x2d, params["w_ih_t"], params["b_g"], w_rec,
      params["w_fc_t"], params["b_out"])

    return y2d.reshape(S, Bp, O)[:, :B, :]


def lstm_rnn_reference(x, w_ih, w_hh, b_ih, b_hh, w_fc, b_fc):
    """Pure-JAX reference mirroring PyTorch nn.LSTM (1 layer) + nn.Linear."""
    S, B, I = x.shape
    H = w_hh.shape[1]

    def step(carry, x_t):
        h, c = carry
        gates = x_t @ w_ih.T + b_ih + h @ w_hh.T + b_hh
        i_g = jax.nn.sigmoid(gates[:, 0 * H:1 * H])
        f_g = jax.nn.sigmoid(gates[:, 1 * H:2 * H])
        g_g = jnp.tanh(gates[:, 2 * H:3 * H])
        o_g = jax.nn.sigmoid(gates[:, 3 * H:4 * H])
        c_new = f_g * c + i_g * g_g
        h_new = o_g * jnp.tanh(c_new)
        return (h_new, c_new), h_new

    h0 = jnp.zeros((B, H), jnp.float32)
    c0 = jnp.zeros((B, H), jnp.float32)
    _, hs = jax.lax.scan(step, (h0, c0), x)           # (S, B, H)
    y = hs @ w_fc.T + b_fc                            # (S, B, O)
    return y


if __name__ == "__main__":
    # shapes implied by the module's forward: _x of shape (seq, batch, input_size)
    S, B, I, H, O = 8, 2, 16, 32, 8

    key = jax.random.PRNGKey(0)
    ks = jax.random.split(key, 7)
    bound = 1.0 / np.sqrt(H)
    init = lambda k, shape: jax.random.uniform(k, shape, jnp.float32, -bound, bound)

    x = jax.random.normal(ks[0], (S, B, I), jnp.float32)
    w_ih = init(ks[1], (4 * H, I))
    w_hh = init(ks[2], (4 * H, H))
    b_ih = init(ks[3], (4 * H,))
    b_hh = init(ks[4], (4 * H,))
    w_fc = init(ks[5], (O, H))
    b_fc = init(ks[6], (O,))

    # One-time parameter prep (reorder/transpose/pre-scale/FC-append) -- off the hot path.
    params = prepare_lstm_params(w_ih, w_hh, b_ih, b_hh, w_fc, b_fc)

    fwd = jax.jit(lstm_rnn_forward)
    y = jax.block_until_ready(fwd(x, params))

    y_ref = lstm_rnn_reference(x, w_ih, w_hh, b_ih, b_hh, w_fc, b_fc)
    np.testing.assert_allclose(np.asarray(y), np.asarray(y_ref), rtol=1e-4, atol=2e-5)

    print("KERNEL_OK")
</pallas_src>

<mosaic_0001>
module attributes {stable_mosaic.version = 11 : i64} {
  func.func @_lstm_rnn_kernel(%arg0: i32, %arg1: memref<64x16xf32, #tpu.memory_space<vmem>>, %arg2: memref<16x128xf32, #tpu.memory_space<vmem>>, %arg3: memref<1x128xf32, #tpu.memory_space<vmem>>, %arg4: memref<32x128xf32, #tpu.memory_space<vmem>>, %arg5: memref<32x8xf32, #tpu.memory_space<vmem>>, %arg6: memref<1x8xf32, #tpu.memory_space<vmem>>, %arg7: memref<64x8xf32, #tpu.memory_space<vmem>>) attributes {dimension_semantics = [#tpu.dimension_semantics<arbitrary>], iteration_bounds = array<i64: 1>, scalar_prefetch = 0 : i64, scratch_operands = 0 : i64, tpu.core_type = #tpu.core_type<tc>, window_params = [{pipeline_mode = #tpu.pipeline_mode<synchronous>, transform_indices = @transform_0, window_bounds = array<i64: 64, 16>}, {pipeline_mode = #tpu.pipeline_mode<synchronous>, transform_indices = @transform_1, window_bounds = array<i64: 16, 128>}, {pipeline_mode = #tpu.pipeline_mode<synchronous>, transform_indices = @transform_2, window_bounds = array<i64: 1, 128>}, {pipeline_mode = #tpu.pipeline_mode<synchronous>, transform_indices = @transform_3, window_bounds = array<i64: 32, 128>}, {pipeline_mode = #tpu.pipeline_mode<synchronous>, transform_indices = @transform_4, window_bounds = array<i64: 32, 8>}, {pipeline_mode = #tpu.pipeline_mode<synchronous>, transform_indices = @transform_5, window_bounds = array<i64: 1, 8>}, {pipeline_mode = #tpu.pipeline_mode<synchronous>, transform_indices = @transform_6, window_bounds = array<i64: 64, 8>}]} {
    %c0 = arith.constant 0 : index
    %c0_0 = arith.constant 0 : index
    %0 = vector.load %arg1[%c0, %c0_0] : memref<64x16xf32, #tpu.memory_space<vmem>>, vector<64x16xf32>
    %c0_1 = arith.constant 0 : index
    %c0_2 = arith.constant 0 : index
    %1 = vector.load %arg2[%c0_1, %c0_2] : memref<16x128xf32, #tpu.memory_space<vmem>>, vector<16x128xf32>
    %cst = arith.constant dense<0.000000e+00> : vector<64x128xf32>
    %2 = tpu.matmul %0, %1, %cst {dimension_numbers = #tpu.dot_dimension_numbers<[1], [0], [0], [1], [0, 0, 1, 1], [], []>} : vector<64x16xf32>, vector<16x128xf32>, vector<64x128xf32> -> vector<64x128xf32>
    %c0_3 = arith.constant 0 : index
    %c0_4 = arith.constant 0 : index
    %3 = vector.load %arg3[%c0_3, %c0_4] : memref<1x128xf32, #tpu.memory_space<vmem>>, vector<1x128xf32>
    %4 = vector.broadcast %3 : vector<1x128xf32> to vector<64x128xf32>
    %5 = arith.addf %2, %4 : vector<64x128xf32>
    %c0_5 = arith.constant 0 : index
    %c0_6 = arith.constant 0 : index
    %6 = vector.load %arg4[%c0_5, %c0_6] : memref<32x128xf32, #tpu.memory_space<vmem>>, vector<32x128xf32>
    %c0_7 = arith.constant 0 : index
    %c0_8 = arith.constant 0 : index
    %7 = vector.load %arg5[%c0_7, %c0_8] : memref<32x8xf32, #tpu.memory_space<vmem>>, vector<32x8xf32>
    %cst_9 = arith.constant 0.000000e+00 : f32
    %8 = vector.broadcast %cst_9 : f32 to vector<8x32xf32>
    %cst_10 = arith.constant 0.000000e+00 : f32
    %9 = vector.broadcast %cst_10 : f32 to vector<8x32xf32>
    %cst_11 = arith.constant dense<0.000000e+00> : vector<8x128xf32>
    %10 = tpu.matmul %8, %6, %cst_11 {dimension_numbers = #tpu.dot_dimension_numbers<[1], [0], [0], [1], [0, 0, 1, 1], [], []>} : vector<8x32xf32>, vector<32x128xf32>, vector<8x128xf32> -> vector<8x128xf32>
    %11 = vector.extract_strided_slice %5 {offsets = [0, 0], sizes = [8, 128], strides = [1, 1]} : vector<64x128xf32> to vector<8x128xf32>
    %12 = arith.addf %11, %10 : vector<8x128xf32>
    %13 = arith.negf %12 : vector<8x128xf32>
    %14 = math.exp %13 : vector<8x128xf32>
    %cst_12 = arith.constant 1.000000e+00 : f32
    %15 = vector.broadcast %cst_12 : f32 to vector<8x128xf32>
    %16 = arith.addf %15, %14 : vector<8x128xf32>
    %17 = arith.divf %15, %16 : vector<8x128xf32>
    %18 = vector.extract_strided_slice %17 {offsets = [0, 0], sizes = [8, 32], strides = [1, 1]} : vector<8x128xf32> to vector<8x32xf32>
    %19 = vector.extract_strided_slice %17 {offsets = [0, 32], sizes = [8, 32], strides = [1, 1]} : vector<8x128xf32> to vector<8x32xf32>
    %20 = vector.extract_strided_slice %17 {offsets = [0, 64], sizes = [8, 32], strides = [1, 1]} : vector<8x128xf32> to vector<8x32xf32>
    %21 = vector.extract_strided_slice %17 {offsets = [0, 96], sizes = [8, 32], strides = [1, 1]} : vector<8x128xf32> to vector<8x32xf32>
    %cst_13 = arith.constant 2.000000e+00 : f32
    %22 = vector.broadcast %cst_13 : f32 to vector<8x32xf32>
    %23 = arith.mulf %22, %21 : vector<8x32xf32>
    %cst_14 = arith.constant 1.000000e+00 : f32
    %24 = vector.broadcast %cst_14 : f32 to vector<8x32xf32>
    %25 = arith.subf %23, %24 : vector<8x32xf32>
    %26 = arith.mulf %19, %9 : vector<8x32xf32>
    %27 = arith.mulf %18, %25 : vector<8x32xf32>
    %28 = arith.addf %26, %27 : vector<8x32xf32>
    %29 = math.tanh %28 : vector<8x32xf32>
    %30 = arith.mulf %20, %29 : vector<8x32xf32>
    %cst_15 = arith.constant dense<0.000000e+00> : vector<8x128xf32>
    %31 = tpu.matmul %30, %6, %cst_15 {dimension_numbers = #tpu.dot_dimension_numbers<[1], [0], [0], [1], [0, 0, 1, 1], [], []>} : vector<8x32xf32>, vector<32x128xf32>, vector<8x128xf32> -> vector<8x128xf32>
    %32 = vector.extract_strided_slice %5 {offsets = [8, 0], sizes = [8, 128], strides = [1, 1]} : vector<64x128xf32> to vector<8x128xf32>
    %33 = arith.addf %32, %31 : vector<8x128xf32>
    %34 = arith.negf %33 : vector<8x128xf32>
    %35 = math.exp %34 : vector<8x128xf32>
    %cst_16 = arith.constant 1.000000e+00 : f32
    %36 = vector.broadcast %cst_16 : f32 to vector<8x128xf32>
    %37 = arith.addf %36, %35 : vector<8x128xf32>
    %38 = arith.divf %36, %37 : vector<8x128xf32>
    %39 = vector.extract_strided_slice %38 {offsets = [0, 0], sizes = [8, 32], strides = [1, 1]} : vector<8x128xf32> to vector<8x32xf32>
    %40 = vector.extract_strided_slice %38 {offsets = [0, 32], sizes = [8, 32], strides = [1, 1]} : vector<8x128xf32> to vector<8x32xf32>
    %41 = vector.extract_strided_slice %38 {offsets = [0, 64], sizes = [8, 32], strides = [1, 1]} : vector<8x128xf32> to vector<8x32xf32>
    %42 = vector.extract_strided_slice %38 {offsets = [0, 96], sizes = [8, 32], strides = [1, 1]} : vector<8x128xf32> to vector<8x32xf32>
    %cst_17 = arith.constant 2.000000e+00 : f32
    %43 = vector.broadcast %cst_17 : f32 to vector<8x32xf32>
    %44 = arith.mulf %43, %42 : vector<8x32xf32>
    %cst_18 = arith.constant 1.000000e+00 : f32
    %45 = vector.broadcast %cst_18 : f32 to vector<8x32xf32>
    %46 = arith.subf %44, %45 : vector<8x32xf32>
    %47 = arith.mulf %40, %28 : vector<8x32xf32>
    %48 = arith.mulf %39, %46 : vector<8x32xf32>
    %49 = arith.addf %47, %48 : vector<8x32xf32>
    %50 = math.tanh %49 : vector<8x32xf32>
    %51 = arith.mulf %41, %50 : vector<8x32xf32>
    %cst_19 = arith.constant dense<0.000000e+00> : vector<8x128xf32>
    %52 = tpu.matmul %51, %6, %cst_19 {dimension_numbers = #tpu.dot_dimension_numbers<[1], [0], [0], [1], [0, 0, 1, 1], [], []>} : vector<8x32xf32>, vector<32x128xf32>, vector<8x128xf32> -> vector<8x128xf32>
    %53 = vector.extract_strided_slice %5 {offsets = [16, 0], sizes = [8, 128], strides = [1, 1]} : vector<64x128xf32> to vector<8x128xf32>
    %54 = arith.addf %53, %52 : vector<8x128xf32>
    %55 = arith.negf %54 : vector<8x128xf32>
    %56 = math.exp %55 : vector<8x128xf32>
    %cst_20 = arith.constant 1.000000e+00 : f32
    %57 = vector.broadcast %cst_20 : f32 to vector<8x128xf32>
    %58 = arith.addf %57, %56 : vector<8x128xf32>
    %59 = arith.divf %57, %58 : vector<8x128xf32>
    %60 = vector.extract_strided_slice %59 {offsets = [0, 0], sizes = [8, 32], strides = [1, 1]} : vector<8x128xf32> to vector<8x32xf32>
    %61 = vector.extract_strided_slice %59 {offsets = [0, 32], sizes = [8, 32], strides = [1, 1]} : vector<8x128xf32> to vector<8x32xf32>
    %62 = vector.extract_strided_slice %59 {offsets = [0, 64], sizes = [8, 32], strides = [1, 1]} : vector<8x128xf32> to vector<8x32xf32>
    %63 = vector.extract_strided_slice %59 {offsets = [0, 96], sizes = [8, 32], strides = [1, 1]} : vector<8x128xf32> to vector<8x32xf32>
    %cst_21 = arith.constant 2.000000e+00 : f32
    %64 = vector.broadcast %cst_21 : f32 to vector<8x32xf32>
    %65 = arith.mulf %64, %63 : vector<8x32xf32>
    %cst_22 = arith.constant 1.000000e+00 : f32
    %66 = vector.broadcast %cst_22 : f32 to vector<8x32xf32>
    %67 = arith.subf %65, %66 : vector<8x32xf32>
    %68 = arith.mulf %61, %49 : vector<8x32xf32>
    %69 = arith.mulf %60, %67 : vector<8x32xf32>
    %70 = arith.addf %68, %69 : vector<8x32xf32>
    %71 = math.tanh %70 : vector<8x32xf32>
    %72 = arith.mulf %62, %71 : vector<8x32xf32>
    %cst_23 = arith.constant dense<0.000000e+00> : vector<8x128xf32>
    %73 = tpu.matmul %72, %6, %cst_23 {dimension_numbers = #tpu.dot_dimension_numbers<[1], [0], [0], [1], [0, 0, 1, 1], [], []>} : vector<8x32xf32>, vector<32x128xf32>, vector<8x128xf32> -> vector<8x128xf32>
    %74 = vector.extract_strided_slice %5 {offsets = [24, 0], sizes = [8, 128], strides = [1, 1]} : vector<64x128xf32> to vector<8x128xf32>
    %75 = arith.addf %74, %73 : vector<8x128xf32>
    %76 = arith.negf %75 : vector<8x128xf32>
    %77 = math.exp %76 : vector<8x128xf32>
    %cst_24 = arith.constant 1.000000e+00 : f32
    %78 = vector.broadcast %cst_24 : f32 to vector<8x128xf32>
    %79 = arith.addf %78, %77 : vector<8x128xf32>
    %80 = arith.divf %78, %79 : vector<8x128xf32>
    %81 = vector.extract_strided_slice %80 {offsets = [0, 0], sizes = [8, 32], strides = [1, 1]} : vector<8x128xf32> to vector<8x32xf32>
    %82 = vector.extract_strided_slice %80 {offsets = [0, 32], sizes = [8, 32], strides = [1, 1]} : vector<8x128xf32> to vector<8x32xf32>
    %83 = vector.extract_strided_slice %80 {offsets = [0, 64], sizes = [8, 32], strides = [1, 1]} : vector<8x128xf32> to vector<8x32xf32>
    %84 = vector.extract_strided_slice %80 {offsets = [0, 96], sizes = [8, 32], strides = [1, 1]} : vector<8x128xf32> to vector<8x32xf32>
    %cst_25 = arith.constant 2.000000e+00 : f32
    %85 = vector.broadcast %cst_25 : f32 to vector<8x32xf32>
    %86 = arith.mulf %85, %84 : vector<8x32xf32>
    %cst_26 = arith.constant 1.000000e+00 : f32
    %87 = vector.broadcast %cst_26 : f32 to vector<8x32xf32>
    %88 = arith.subf %86, %87 : vector<8x32xf32>
    %89 = arith.mulf %82, %70 : vector<8x32xf32>
    %90 = arith.mulf %81, %88 : vector<8x32xf32>
    %91 = arith.addf %89, %90 : vector<8x32xf32>
    %92 = math.tanh %91 : vector<8x32xf32>
    %93 = arith.mulf %83, %92 : vector<8x32xf32>
    %cst_27 = arith.constant dense<0.000000e+00> : vector<8x128xf32>
    %94 = tpu.matmul %93, %6, %cst_27 {dimension_numbers = #tpu.dot_dimension_numbers<[1], [0], [0], [1], [0, 0, 1, 1], [], []>} : vector<8x32xf32>, vector<32x128xf32>, vector<8x128xf32> -> vector<8x128xf32>
    %95 = vector.extract_strided_slice %5 {offsets = [32, 0], sizes = [8, 128], strides = [1, 1]} : vector<64x128xf32> to vector<8x128xf32>
    %96 = arith.addf %95, %94 : vector<8x128xf32>
    %97 = arith.negf %96 : vector<8x128xf32>
    %98 = math.exp %97 : vector<8x128xf32>
    %cst_28 = arith.constant 1.000000e+00 : f32
    %99 = vector.broadcast %cst_28 : f32 to vector<8x128xf32>
    %100 = arith.addf %99, %98 : vector<8x128xf32>
    %101 = arith.divf %99, %100 : vector<8x128xf32>
    %102 = vector.extract_strided_slice %101 {offsets = [0, 0], sizes = [8, 32], strides = [1, 1]} : vector<8x128xf32> to vector<8x32xf32>
    %103 = vector.extract_strided_slice %101 {offsets = [0, 32], sizes = [8, 32], strides = [1, 1]} : vector<8x128xf32> to vector<8x32xf32>
    %104 = vector.extract_strided_slice %101 {offsets = [0, 64], sizes = [8, 32], strides = [1, 1]} : vector<8x128xf32> to vector<8x32xf32>
    %105 = vector.extract_strided_slice %101 {offsets = [0, 96], sizes = [8, 32], strides = [1, 1]} : vector<8x128xf32> to vector<8x32xf32>
    %cst_29 = arith.constant 2.000000e+00 : f32
    %106 = vector.broadcast %cst_29 : f32 to vector<8x32xf32>
    %107 = arith.mulf %106, %105 : vector<8x32xf32>
    %cst_30 = arith.constant 1.000000e+00 : f32
    %108 = vector.broadcast %cst_30 : f32 to vector<8x32xf32>
    %109 = arith.subf %107, %108 : vector<8x32xf32>
    %110 = arith.mulf %103, %91 : vector<8x32xf32>
    %111 = arith.mulf %102, %109 : vector<8x32xf32>
    %112 = arith.addf %110, %111 : vector<8x32xf32>
    %113 = math.tanh %112 : vector<8x32xf32>
    %114 = arith.mulf %104, %113 : vector<8x32xf32>
    %cst_31 = arith.constant dense<0.000000e+00> : vector<8x128xf32>
    %115 = tpu.matmul %114, %6, %cst_31 {dimension_numbers = #tpu.dot_dimension_numbers<[1], [0], [0], [1], [0, 0, 1, 1], [], []>} : vector<8x32xf32>, vector<32x128xf32>, vector<8x128xf32> -> vector<8x128xf32>
    %116 = vector.extract_strided_slice %5 {offsets = [40, 0], sizes = [8, 128], strides = [1, 1]} : vector<64x128xf32> to vector<8x128xf32>
    %117 = arith.addf %116, %115 : vector<8x128xf32>
    %118 = arith.negf %117 : vector<8x128xf32>
    %119 = math.exp %118 : vector<8x128xf32>
    %cst_32 = arith.constant 1.000000e+00 : f32
    %120 = vector.broadcast %cst_32 : f32 to vector<8x128xf32>
    %121 = arith.addf %120, %119 : vector<8x128xf32>
    %122 = arith.divf %120, %121 : vector<8x128xf32>
    %123 = vector.extract_strided_slice %122 {offsets = [0, 0], sizes = [8, 32], strides = [1, 1]} : vector<8x128xf32> to vector<8x32xf32>
    %124 = vector.extract_strided_slice %122 {offsets = [0, 32], sizes = [8, 32], strides = [1, 1]} : vector<8x128xf32> to vector<8x32xf32>
    %125 = vector.extract_strided_slice %122 {offsets = [0, 64], sizes = [8, 32], strides = [1, 1]} : vector<8x128xf32> to vector<8x32xf32>
    %126 = vector.extract_strided_slice %122 {offsets = [0, 96], sizes = [8, 32], strides = [1, 1]} : vector<8x128xf32> to vector<8x32xf32>
    %cst_33 = arith.constant 2.000000e+00 : f32
    %127 = vector.broadcast %cst_33 : f32 to vector<8x32xf32>
    %128 = arith.mulf %127, %126 : vector<8x32xf32>
    %cst_34 = arith.constant 1.000000e+00 : f32
    %129 = vector.broadcast %cst_34 : f32 to vector<8x32xf32>
    %130 = arith.subf %128, %129 : vector<8x32xf32>
    %131 = arith.mulf %124, %112 : vector<8x32xf32>
    %132 = arith.mulf %123, %130 : vector<8x32xf32>
    %133 = arith.addf %131, %132 : vector<8x32xf32>
    %134 = math.tanh %133 : vector<8x32xf32>
    %135 = arith.mulf %125, %134 : vector<8x32xf32>
    %cst_35 = arith.constant dense<0.000000e+00> : vector<8x128xf32>
    %136 = tpu.matmul %135, %6, %cst_35 {dimension_numbers = #tpu.dot_dimension_numbers<[1], [0], [0], [1], [0, 0, 1, 1], [], []>} : vector<8x32xf32>, vector<32x128xf32>, vector<8x128xf32> -> vector<8x128xf32>
    %137 = vector.extract_strided_slice %5 {offsets = [48, 0], sizes = [8, 128], strides = [1, 1]} : vector<64x128xf32> to vector<8x128xf32>
    %138 = arith.addf %137, %136 : vector<8x128xf32>
    %139 = arith.negf %138 : vector<8x128xf32>
    %140 = math.exp %139 : vector<8x128xf32>
    %cst_36 = arith.constant 1.000000e+00 : f32
    %141 = vector.broadcast %cst_36 : f32 to vector<8x128xf32>
    %142 = arith.addf %141, %140 : vector<8x128xf32>
    %143 = arith.divf %141, %142 : vector<8x128xf32>
    %144 = vector.extract_strided_slice %143 {offsets = [0, 0], sizes = [8, 32], strides = [1, 1]} : vector<8x128xf32> to vector<8x32xf32>
    %145 = vector.extract_strided_slice %143 {offsets = [0, 32], sizes = [8, 32], strides = [1, 1]} : vector<8x128xf32> to vector<8x32xf32>
    %146 = vector.extract_strided_slice %143 {offsets = [0, 64], sizes = [8, 32], strides = [1, 1]} : vector<8x128xf32> to vector<8x32xf32>
    %147 = vector.extract_strided_slice %143 {offsets = [0, 96], sizes = [8, 32], strides = [1, 1]} : vector<8x128xf32> to vector<8x32xf32>
    %cst_37 = arith.constant 2.000000e+00 : f32
    %148 = vector.broadcast %cst_37 : f32 to vector<8x32xf32>
    %149 = arith.mulf %148, %147 : vector<8x32xf32>
    %cst_38 = arith.constant 1.000000e+00 : f32
    %150 = vector.broadcast %cst_38 : f32 to vector<8x32xf32>
    %151 = arith.subf %149, %150 : vector<8x32xf32>
    %152 = arith.mulf %145, %133 : vector<8x32xf32>
    %153 = arith.mulf %144, %151 : vector<8x32xf32>
    %154 = arith.addf %152, %153 : vector<8x32xf32>
    %155 = math.tanh %154 : vector<8x32xf32>
    %156 = arith.mulf %146, %155 : vector<8x32xf32>
    %cst_39 = arith.constant dense<0.000000e+00> : vector<8x128xf32>
    %157 = tpu.matmul %156, %6, %cst_39 {dimension_numbers = #tpu.dot_dimension_numbers<[1], [0], [0], [1], [0, 0, 1, 1], [], []>} : vector<8x32xf32>, vector<32x128xf32>, vector<8x128xf32> -> vector<8x128xf32>
    %158 = vector.extract_strided_slice %5 {offsets = [56, 0], sizes = [8, 128], strides = [1, 1]} : vector<64x128xf32> to vector<8x128xf32>
    %159 = arith.addf %158, %157 : vector<8x128xf32>
    %160 = arith.negf %159 : vector<8x128xf32>
    %161 = math.exp %160 : vector<8x128xf32>
    %cst_40 = arith.constant 1.000000e+00 : f32
    %162 = vector.broadcast %cst_40 : f32 to vector<8x128xf32>
    %163 = arith.addf %162, %161 : vector<8x128xf32>
    %164 = arith.divf %162, %163 : vector<8x128xf32>
    %165 = vector.extract_strided_slice %164 {offsets = [0, 0], sizes = [8, 32], strides = [1, 1]} : vector<8x128xf32> to vector<8x32xf32>
    %166 = vector.extract_strided_slice %164 {offsets = [0, 32], sizes = [8, 32], strides = [1, 1]} : vector<8x128xf32> to vector<8x32xf32>
    %167 = vector.extract_strided_slice %164 {offsets = [0, 64], sizes = [8, 32], strides = [1, 1]} : vector<8x128xf32> to vector<8x32xf32>
    %168 = vector.extract_strided_slice %164 {offsets = [0, 96], sizes = [8, 32], strides = [1, 1]} : vector<8x128xf32> to vector<8x32xf32>
    %cst_41 = arith.constant 2.000000e+00 : f32
    %169 = vector.broadcast %cst_41 : f32 to vector<8x32xf32>
    %170 = arith.mulf %169, %168 : vector<8x32xf32>
    %cst_42 = arith.constant 1.000000e+00 : f32
    %171 = vector.broadcast %cst_42 : f32 to vector<8x32xf32>
    %172 = arith.subf %170, %171 : vector<8x32xf32>
    %173 = arith.mulf %166, %154 : vector<8x32xf32>
    %174 = arith.mulf %165, %172 : vector<8x32xf32>
    %175 = arith.addf %173, %174 : vector<8x32xf32>
    %176 = math.tanh %175 : vector<8x32xf32>
    %177 = arith.mulf %167, %176 : vector<8x32xf32>
    %178 = tpu.concatenate %30, %51, %72, %93, %114, %135, %156, %177 in 0 : vector<8x32xf32>, vector<8x32xf32>, vector<8x32xf32>, vector<8x32xf32>, vector<8x32xf32>, vector<8x32xf32>, vector<8x32xf32>, vector<8x32xf32> -> vector<64x32xf32>
    %cst_43 = arith.constant dense<0.000000e+00> : vector<64x8xf32>
    %179 = tpu.matmul %178, %7, %cst_43 {dimension_numbers = #tpu.dot_dimension_numbers<[1], [0], [0], [1], [0, 0, 1, 1], [], []>} : vector<64x32xf32>, vector<32x8xf32>, vector<64x8xf32> -> vector<64x8xf32>
    %c0_44 = arith.constant 0 : index
    %c0_45 = arith.constant 0 : index
    %180 = vector.load %arg6[%c0_44, %c0_45] : memref<1x8xf32, #tpu.memory_space<vmem>>, vector<1x8xf32>
    %181 = vector.broadcast %180 : vector<1x8xf32> to vector<64x8xf32>
    %182 = arith.addf %179, %181 : vector<64x8xf32>
    %c0_46 = arith.constant 0 : index
    %c0_47 = arith.constant 0 : index
    %183 = vector.load %arg7[%c0_46, %c0_47] : memref<64x8xf32, #tpu.memory_space<vmem>>, vector<64x8xf32>
    tpu.vector_store %arg7[%c0_46, %c0_47], %182 {strides = array<i32>} : memref<64x8xf32, #tpu.memory_space<vmem>>, vector<64x8xf32>,
    return
  }
  func.func @transform_0(%arg0: i32) -> (i32, i32) {
    %c0_i32 = arith.constant 0 : i32
    %c0_i32_0 = arith.constant 0 : i32
    %c0_i32_1 = arith.constant 0 : i32
    return %c0_i32, %c0_i32_0 : i32, i32
  }
  func.func @transform_1(%arg0: i32) -> (i32, i32) {
    %c0_i32 = arith.constant 0 : i32
    %c0_i32_0 = arith.constant 0 : i32
    %c0_i32_1 = arith.constant 0 : i32
    return %c0_i32, %c0_i32_0 : i32, i32
  }
  func.func @transform_2(%arg0: i32) -> (i32, i32) {
    %c0_i32 = arith.constant 0 : i32
    %c0_i32_0 = arith.constant 0 : i32
    %c0_i32_1 = arith.constant 0 : i32
    return %c0_i32, %c0_i32_0 : i32, i32
  }
  func.func @transform_3(%arg0: i32) -> (i32, i32) {
    %c0_i32 = arith.constant 0 : i32
    %c0_i32_0 = arith.constant 0 : i32
    %c0_i32_1 = arith.constant 0 : i32
    return %c0_i32, %c0_i32_0 : i32, i32
  }
  func.func @transform_4(%arg0: i32) -> (i32, i32) {
    %c0_i32 = arith.constant 0 : i32
    %c0_i32_0 = arith.constant 0 : i32
    %c0_i32_1 = arith.constant 0 : i32
    return %c0_i32, %c0_i32_0 : i32, i32
  }
  func.func @transform_5(%arg0: i32) -> (i32, i32) {
    %c0_i32 = arith.constant 0 : i32
    %c0_i32_0 = arith.constant 0 : i32
    %c0_i32_1 = arith.constant 0 : i32
    return %c0_i32, %c0_i32_0 : i32, i32
  }
  func.func @transform_6(%arg0: i32) -> (i32, i32) {
    %c0_i32 = arith.constant 0 : i32
    %c0_i32_0 = arith.constant 0 : i32
    %c0_i32_1 = arith.constant 0 : i32
    return %c0_i32, %c0_i32_0 : i32, i32
  }
}

</mosaic_0001>

<bundles_post_ra>
// kernel: lstm_rnn_forward.1
= control target key start
LH: loop header
LB: loop body
LE: loop exit
PB: predicated region body
PF: predicated region fallthrough
CT: control target
= control target key end

     0   :  { %vm40_vm0 = vcmask 130048   ;;  %v1398_v6 = vmov 0.0   ;;  %vm1399_vm1 = vmmov 0   ;;  %s1400_s21 = smov 32   ;;  %vm178_vm2 = vcmask 261120   ;;  %s1725_s1 = inlined_call_operand.vmem [shape: f32[16,128], index: 1, kind: input, shape index: {}]   ;;  %s1726_s0 = inlined_call_operand.vmem [shape: f32[64,16], index: 0, kind: input, shape index: {}]   ;;  %s1727_s3 = inlined_call_operand.vmem [shape: f32[32,128], index: 3, kind: input, shape index: {}]   ;;  %s1728_s2 = inlined_call_operand.vmem [shape: f32[1,128], index: 2, kind: input, shape index: {}]   ;;  %s1729_s4 = inlined_call_operand.vmem [shape: f32[32,8], index: 4, kind: input, shape index: {}]   ;;  %s1730_s5 = inlined_call_operand.vmem [shape: f32[1,8], index: 5, kind: input, shape index: {}]   ;;  %s1731_s6 = inlined_call_operand.vmem [shape: f32[64,8], index: 6, kind: output, shape index: {}]  }
   0x1   :  { %v32_v0 = vld [vmem:[%s1725_s1 + $0x8] sm:$0xff]  ;;  %v31_v1 = vld [vmem:[%s1725_s1] sm:$0xff]  ;;  %v1453_v4 = vld [vmem:[%s1727_s3 + $0x18] sm:$0xff]  ;;  %vm1102_vm3 = vcmask 64512  }
   0x2   :  { %v27_v2 = vld [vmem:[%s1726_s0 + $0x20] sm:$0xff]  ;;  %1342 = vmatprep.subr.mxu1 %v32_v0  ;;  %1218 = vmatprep.subr.mxu0 %v32_v0  ;;  %v28_v3 = vld [vmem:[%s1726_s0 + $0x28] sm:$0xff]  ;;  %v29_v8 = vld [vmem:[%s1726_s0 + $0x30] sm:$0xff] }
   0x3   :  { %1344 = vmatpush3.msra.mxu1 %v32_v0  ;;  %1228 = vmatprep.mubr.msk.f32.mxu1 %vm40_vm0, %v27_v2  ;;  %v23_v5 = vld [vmem:[%s1726_s0] sm:$0xff]  ;;  %v24_v7 = vld [vmem:[%s1726_s0 + $0x8] sm:$0xff]  ;;  %v1470_v9 = vld [vmem:[%s1727_s3 + $0x10] sm:$0xff] }
   0x4   :  { %1343 = vmatprep.subr.mxu1 %v31_v1  ;;  %1219 = vmatpush3.msra.mxu0 %v32_v0  ;;  %v30_v10 = vld [vmem:[%s1726_s0 + $0x38] sm:$0xff]  ;;  %v1482_v11 = vld [vmem:[%s1727_s3 + $0x8] sm:$0xff]  ;;  %v1491_v12 = vld [vmem:[%s1727_s3] sm:$0xff] }
   0x5   :  { %1345 = vmatpush3.msra.mxu1 %v31_v1  ;;  %1220 = vmatprep.subr.mxu0 %v31_v1  ;;  %v1527_v18 = vld [vmem:[%s1728_s2] ss:$0 sm:$0xff]  ;;  %s1401_s2 = smov 64   ;;  %v25_v54 = vld [vmem:[%s1726_s0 + $0x10] sm:$0xff]  ;;  %v26_v55 = vld [vmem:[%s1726_s0 + $0x18] sm:$0xff] }
   0x6   :  { %1229 = vmatmul.mubr.msk.f32.vlgmr.msra.gmra.mxu1 %vm40_vm0, %v28_v3  ;;  %1234 = vmatprep.subr.mxu1 %v1398_v6 }
   0x7   :  { %1235 = vmatpush3.msra.mxu1 %v1453_v4  ;;  %1221 = vmatpush3.msra.mxu0 %v31_v1 }
   0x8   :  { %1222 = vmatprep.mubr.msk.f32.mxu0 %vm40_vm0, %v23_v5  ;;  %1236 = vmatprep.subr.mxu1 %v1398_v6 }
   0x9   :  { %1223 = vmatmul.mubr.msk.f32.vlgmr.msra.gmra.mxu0 %vm40_vm0, %v24_v7  ;;  %1231 = vmatprep.mubr.msk.f32.mxu1 %vm40_vm0, %v29_v8 }
   0xa   :  { %1237 = vmatpush3.msra.mxu1 %v1470_v9  ;;  %1256 = vmatprep.subr.mxu0 %v1398_v6 }
   0xb   :  { %1232 = vmatmul.mubr.msk.f32.gmra.mxu1 %vm40_vm0, %v30_v10  ;;  %1238 = vmatprep.subr.mxu1 %v1398_v6 }
   0xc   :  { %1239 = vmatpush3.msra.mxu1 %v1482_v11  ;;  %1242 = vmatprep.mubr.msk.f32.mxu1 %vm1399_vm1, %v1398_v6 }
   0xd   :  { %1240 = vmatprep.subr.mxu1 %v1398_v6  ;;  %1257 = vmatpush3.msra.mxu0 %v1453_v4 }
   0xe   :  { %1241 = vmatpush3.msra.mxu1 %v1491_v12  ;;  %1258 = vmatprep.subr.mxu0 %v1398_v6 }
   0xf   :  { %1243 = vmatmul.mubr.f32.vlgmr.msra.gmra.mxu1 %v1398_v6  ;;  %1245 = vmatprep.subr.mxu1 %v1398_v6 }
  0x10   :  { %1246 = vmatpush3.msra.mxu1 %v1453_v4  ;;  %1253 = vmatprep.mubr.msk.f32.mxu1 %vm1399_vm1, %v1398_v6 }
  0x11   :  { %1247 = vmatprep.subr.mxu1 %v1398_v6  ;;  %1259 = vmatpush3.msra.mxu0 %v1470_v9 }
  0x12   :  { %1248 = vmatpush3.msra.mxu1 %v1470_v9  ;;  %1260 = vmatprep.subr.mxu0 %v1398_v6 }
  0x13   :  { %1249 = vmatprep.subr.mxu1 %v1398_v6  ;;  %1261 = vmatpush3.msra.mxu0 %v1482_v11 }
  0x14   :  { %1250 = vmatpush3.msra.mxu1 %v1482_v11  ;;  %1262 = vmatprep.subr.mxu0 %v1398_v6 }
  0x15   :  { %1251 = vmatprep.subr.mxu1 %v1398_v6  ;;  %1263 = vmatpush3.msra.mxu0 %v1491_v12 }
  0x16   :  { %1252 = vmatpush3.msra.mxu1 %v1491_v12  ;;  %1278 = vmatprep.subr.mxu0 %v1398_v6 }
  0x17   :  { %1267 = vmatprep.subr.mxu1 %v1398_v6  ;;  %1225 = vmatprep.mubr.msk.f32.mxu0 %vm40_vm0, %v25_v54 }
  0x18   :  { %1226 = vmatmul.mubr.msk.f32.gmra.mxu0 %vm40_vm0, %v26_v55 }
  0x19   :  { %1264 = vmatprep.mubr.msk.f32.mxu0 %vm1399_vm1, %v1398_v6 }
  0xc6   :  { %v1518_v13 = vpop.f32.mrf.mxu1 }
  0xc8   :  { %v1520_v14 = vpop.f32.mrf.mxu1 }
  0xc9   :  { %v1224_v15 = vpop.f32.mrf.mxu0 }
  0xca   :  { %v137_v39 = vadd.f32 %v1224_v15, %v1527_v18 }
  0xcb   :  { %v1522_v16 = vpop.f32.mrf.mxu1  ;;  %v131_v17 = vpop.f32.mrf.mxu0 }
  0xcc   :  { %v132_v20 = vadd.f32 %v1527_v18, %v131_v17 }
  0xcd   :  { %v1529_v19 = vpop.f32.mrf.mxu1 }
  0xcf   :  { %v248_v21 = vpop.f32.mrf.mxu1 }
  0xd0   :  { %v252_v22 = vadd.f32 %v248_v21, %v132_v20 }
  0xd1   :  { %v1244_v23 = vpop.f32.mrf.mxu1 }
  0xd2   :  { %v1124_v24 = vmul.f32 -1.442695, %v252_v22 }
  0xd4   :  { %1350 = vpow2.f32 %v1124_v24 }
  0xd8   :  { %v1227_v60 = vpop.f32.mrf.mxu0 }
  0xda   :  { %v141_v61 = vpop.f32.mrf.mxu0 }
  0xdb   :  { %v142_v62 = vadd.f32 %v1527_v18, %v141_v61 }
  0xe1   :  { %v1351_v25 = vpop.eup %1350 }
  0xe2   :  { %v256_v26 = vadd.f32 1.0, %v1351_v25 }
  0xe4   :  { %1352 = vrcp.f32 %v256_v26 }
  0xf1   :  { %v1353_v27 = vpop.eup %1352 }
  0xf2   :  { %v259_v28 = vmul.f32 2.0, %v1353_v27  ;;  %v261_v32 = vmul.f32 0.0, %v1353_v27 }
  0xf4   :  { %v1125_v29 = vadd.f32 -1.0, %v259_v28 }
  0xf6   :  { %263 = vrot.lane.b32.xlu0 %v1125_v29, %s1400_s21 }
 0x168   :  { %v264_v30 = vpop.permute.xlu0 %263 }
 0x169   :  { %v266_v31 = vmul.f32 %v1353_v27, %v264_v30 }
 0x16b   :  { %268 = vrot.lane.b32.xlu0 %v266_v31, %s1400_s21 }
 0x1dd   :  { %v269_v33 = vpop.permute.xlu0 %268 }
 0x1de   :  { %v271_v34 = vadd.f32 %v269_v33, %v261_v32 }
 0x1e0   :  { %1354 = vtanh.f32 %v271_v34 }
 0x1ed   :  { %v1355_v35 = vpop.eup %1354 }
 0x1ee   :  { %274 = vrot.lane.b32.xlu1 %v1355_v35, %s1400_s21 }
 0x260   :  { %v275_v36 = vpop.permute.xlu1 %274 }
 0x261   :  { %v277_v37 = vmul.f32 %v1353_v27, %v275_v36  ;;  %v147_v27 = vadd.f32 %v1227_v60, %v1527_v18 }
 0x263   :  { %279 = vrot.lane.b32.xlu1 %v277_v37, %s1401_s2 }
 0x2d5   :  { %v1536_v38 = vpop.permute.xlu1 %279 }
 0x2d6   :  { %1254 = vmatmul.mubr.msk.f32.vlgmr.msra.gmra.mxu1 %vm178_vm2, %v1536_v38 }
 0x2d7   :  { %1268 = vmatpush3.msra.mxu1 %v1453_v4  ;;  %1275 = vmatprep.mubr.msk.f32.mxu1 %vm1399_vm1, %v1398_v6 }
 0x2d8   :  { %1269 = vmatprep.subr.mxu1 %v1398_v6 }
 0x2d9   :  { %1270 = vmatpush3.msra.mxu1 %v1470_v9 }
 0x2da   :  { %1271 = vmatprep.subr.mxu1 %v1398_v6 }
 0x2db   :  { %1272 = vmatpush3.msra.mxu1 %v1482_v11 }
 0x2dc   :  { %1273 = vmatprep.subr.mxu1 %v1398_v6 }
 0x2dd   :  { %1274 = vmatpush3.msra.mxu1 %v1491_v12 }
 0x2de   :  { %1289 = vmatprep.subr.mxu1 %v1398_v6 }
 0x396   :  { %v349_v40 = vpop.f32.mrf.mxu1 }
 0x397   :  { %v353_v41 = vadd.f32 %v349_v40, %v137_v39 }
 0x398   :  { %v1255_v42 = vpop.f32.mrf.mxu1 }
 0x399   :  { %v1127_v43 = vmul.f32 -1.442695, %v353_v41 }
 0x39b   :  { %1356 = vpow2.f32 %v1127_v43 }
 0x3a8   :  { %v1357_v44 = vpop.eup %1356 }
 0x3a9   :  { %v357_v45 = vadd.f32 1.0, %v1357_v44 }
 0x3ab   :  { %1358 = vrcp.f32 %v357_v45 }
 0x3b8   :  { %v1359_v46 = vpop.eup %1358 }
 0x3b9   :  { %v360_v47 = vmul.f32 2.0, %v1359_v46  ;;  %v362_v51 = vmul.f32 %v1359_v46, %v271_v34 }
 0x3bb   :  { %v1128_v48 = vadd.f32 -1.0, %v360_v47  ;;  %v152_v47 = vadd.f32 %v1527_v18, %v1520_v14 }
 0x3bd   :  { %364 = vrot.lane.b32.xlu0 %v1128_v48, %s1400_s21 }
 0x42f   :  { %v365_v49 = vpop.permute.xlu0 %364 }
 0x430   :  { %v367_v50 = vmul.f32 %v1359_v46, %v365_v49 }
 0x432   :  { %369 = vrot.lane.b32.xlu1 %v367_v50, %s1400_s21 }
 0x4a4   :  { %v370_v52 = vpop.permute.xlu1 %369 }
 0x4a5   :  { %v372_v53 = vadd.f32 %v370_v52, %v362_v51 }
 0x4a7   :  { %1360 = vtanh.f32 %v372_v53 }
 0x4b4   :  { %v1361_v56 = vpop.eup %1360 }
 0x4b5   :  { %375 = vrot.lane.b32.xlu0 %v1361_v56, %s1400_s21 }
 0x527   :  { %v376_v57 = vpop.permute.xlu0 %375 }
 0x528   :  { %v378_v58 = vmul.f32 %v1359_v46, %v376_v57 }
 0x52a   :  { %380 = vrot.lane.b32.xlu1 %v378_v58, %s1401_s2 }
 0x59c   :  { %v1565_v59 = vpop.permute.xlu1 %380 }
 0x59d   :  { %1265 = vmatmul.mubr.msk.f32.vlgmr.msra.gmra.mxu0 %vm178_vm2, %v1565_v59 }
 0x59e   :  { %1279 = vmatpush3.msra.mxu0 %v1453_v4  ;;  %1286 = vmatprep.mubr.msk.f32.mxu0 %vm1399_vm1, %v1398_v6 }
 0x59f   :  { %1280 = vmatprep.subr.mxu0 %v1398_v6 }
 0x5a0   :  { %1281 = vmatpush3.msra.mxu0 %v1470_v9 }
 0x5a1   :  { %1282 = vmatprep.subr.mxu0 %v1398_v6 }
 0x5a2   :  { %1283 = vmatpush3.msra.mxu0 %v1482_v11 }
 0x5a3   :  { %1284 = vmatprep.subr.mxu0 %v1398_v6 }
 0x5a4   :  { %1285 = vmatpush3.msra.mxu0 %v1491_v12 }
 0x5a5   :  { %1300 = vmatprep.subr.mxu0 %v1398_v6 }
 0x65d   :  { %v450_v63 = vpop.f32.mrf.mxu0 }
 0x65e   :  { %v454_v0 = vadd.f32 %v450_v63, %v142_v62 }
 0x65f   :  { %v1266_v1 = vpop.f32.mrf.mxu0 }
 0x660   :  { %v1130_v2 = vmul.f32 -1.442695, %v454_v0 }
 0x662   :  { %1362 = vpow2.f32 %v1130_v2  ;;  %v157_v2 = vadd.f32 %v1518_v13, %v1527_v18 }
 0x66f   :  { %v1363_v3 = vpop.eup %1362 }
 0x670   :  { %v458_v5 = vadd.f32 1.0, %v1363_v3 }
 0x672   :  { %1364 = vrcp.f32 %v458_v5 }
 0x67f   :  { %v1365_v7 = vpop.eup %1364 }
 0x680   :  { %v461_v8 = vmul.f32 2.0, %v1365_v7  ;;  %v463_v20 = vmul.f32 %v1365_v7, %v372_v53 }
 0x682   :  { %v1131_v10 = vadd.f32 -1.0, %v461_v8 }
 0x684   :  { %465 = vrot.lane.b32.xlu0 %v1131_v10, %s1400_s21 }
 0x6f6   :  { %v466_v15 = vpop.permute.xlu0 %465 }
 0x6f7   :  { %v468_v17 = vmul.f32 %v1365_v7, %v466_v15 }
 0x6f9   :  { %470 = vrot.lane.b32.xlu1 %v468_v17, %s1400_s21 }
 0x76b   :  { %v471_v21 = vpop.permute.xlu1 %470 }
 0x76c   :  { %v473_v22 = vadd.f32 %v471_v21, %v463_v20  ;;  %v177_v21 = vld [vmem:[%s1729_s4 + $0x18] sm:$0xff] }
 0x76e   :  { %1366 = vtanh.f32 %v473_v22 }
 0x77b   :  { %v1367_v23 = vpop.eup %1366 }
 0x77c   :  { %476 = vrot.lane.b32.xlu0 %v1367_v23, %s1400_s21 }
 0x7ee   :  { %v477_v24 = vpop.permute.xlu0 %476 }
 0x7ef   :  { %v479_v25 = vmul.f32 %v1365_v7, %v477_v24 }
 0x7f1   :  { %481 = vrot.lane.b32.xlu1 %v479_v25, %s1401_s2 }
 0x863   :  { %v1584_v26 = vpop.permute.xlu1 %481 }
 0x864   :  { %1276 = vmatmul.mubr.msk.f32.vlgmr.msra.gmra.mxu1 %vm178_vm2, %v1584_v26 }
 0x865   :  { %1290 = vmatpush3.msra.mxu1 %v1453_v4  ;;  %1297 = vmatprep.mubr.msk.f32.mxu1 %vm1399_vm1, %v1398_v6 }
 0x866   :  { %1291 = vmatprep.subr.mxu1 %v1398_v6 }
 0x867   :  { %1292 = vmatpush3.msra.mxu1 %v1470_v9 }
 0x868   :  { %1293 = vmatprep.subr.mxu1 %v1398_v6 }
 0x869   :  { %1294 = vmatpush3.msra.mxu1 %v1482_v11 }
 0x86a   :  { %1295 = vmatprep.subr.mxu1 %v1398_v6 }
 0x86b   :  { %1296 = vmatpush3.msra.mxu1 %v1491_v12 }
 0x86c   :  { %1311 = vmatprep.subr.mxu1 %v1398_v6 }
 0x924   :  { %v551_v28 = vpop.f32.mrf.mxu1 }
 0x925   :  { %v555_v29 = vadd.f32 %v551_v28, %v147_v27  ;;  %v176_v27 = vld [vmem:[%s1729_s4 + $0x10] sm:$0xff]  ;;  %v175_v28 = vld [vmem:[%s1729_s4 + $0x8] sm:$0xff] }
 0x926   :  { %v1277_v30 = vpop.f32.mrf.mxu1 }
 0x927   :  { %v1133_v31 = vmul.f32 -1.442695, %v555_v29  ;;  %v174_v29 = vld [vmem:[%s1729_s4] sm:$0xff] }
 0x929   :  { %1368 = vpow2.f32 %v1133_v31 }
 0x936   :  { %v1369_v32 = vpop.eup %1368 }
 0x937   :  { %v559_v33 = vadd.f32 1.0, %v1369_v32 }
 0x939   :  { %1370 = vrcp.f32 %v559_v33 }
 0x946   :  { %v1371_v34 = vpop.eup %1370 }
 0x947   :  { %v562_v35 = vmul.f32 2.0, %v1371_v34  ;;  %v564_v40 = vmul.f32 %v1371_v34, %v473_v22 }
 0x949   :  { %v1134_v36 = vadd.f32 -1.0, %v562_v35 }
 0x94b   :  { %566 = vrot.lane.b32.xlu0 %v1134_v36, %s1400_s21 }
 0x9bd   :  { %v567_v37 = vpop.permute.xlu0 %566 }
 0x9be   :  { %v569_v39 = vmul.f32 %v1371_v34, %v567_v37 }
 0x9c0   :  { %571 = vrot.lane.b32.xlu1 %v569_v39, %s1400_s21 }
 0xa32   :  { %v572_v41 = vpop.permute.xlu1 %571 }
 0xa33   :  { %v574_v42 = vadd.f32 %v572_v41, %v564_v40 }
 0xa35   :  { %1372 = vtanh.f32 %v574_v42 }
 0xa42   :  { %v1373_v43 = vpop.eup %1372 }
 0xa43   :  { %577 = vrot.lane.b32.xlu0 %v1373_v43, %s1400_s21 }
 0xab5   :  { %v578_v44 = vpop.permute.xlu0 %577 }
 0xab6   :  { %v580_v45 = vmul.f32 %v1371_v34, %v578_v44 }
 0xab8   :  { %582 = vrot.lane.b32.xlu1 %v580_v45, %s1401_s2 }
 0xb2a   :  { %v1603_v46 = vpop.permute.xlu1 %582 }
 0xb2b   :  { %1287 = vmatmul.mubr.msk.f32.vlgmr.msra.gmra.mxu0 %vm178_vm2, %v1603_v46 }
 0xb2c   :  { %1301 = vmatpush3.msra.mxu0 %v1453_v4  ;;  %1308 = vmatprep.mubr.msk.f32.mxu0 %vm1399_vm1, %v1398_v6 }
 0xb2d   :  { %1302 = vmatprep.subr.mxu0 %v1398_v6 }
 0xb2e   :  { %1303 = vmatpush3.msra.mxu0 %v1470_v9 }
 0xb2f   :  { %1304 = vmatprep.subr.mxu0 %v1398_v6 }
 0xb30   :  { %1305 = vmatpush3.msra.mxu0 %v1482_v11 }
 0xb31   :  { %1306 = vmatprep.subr.mxu0 %v1398_v6 }
 0xb32   :  { %1307 = vmatpush3.msra.mxu0 %v1491_v12 }
 0xb33   :  { %1322 = vmatprep.subr.mxu0 %v177_v21 }
 0xbeb   :  { %v652_v48 = vpop.f32.mrf.mxu0 }
 0xbec   :  { %v656_v49 = vadd.f32 %v652_v48, %v152_v47 }
 0xbed   :  { %v1288_v50 = vpop.f32.mrf.mxu0 }
 0xbee   :  { %v1136_v51 = vmul.f32 -1.442695, %v656_v49 }
 0xbf0   :  { %1374 = vpow2.f32 %v1136_v51 }
 0xbfd   :  { %v1375_v52 = vpop.eup %1374 }
 0xbfe   :  { %v660_v53 = vadd.f32 1.0, %v1375_v52 }
 0xc00   :  { %1376 = vrcp.f32 %v660_v53 }
 0xc0d   :  { %v1377_v54 = vpop.eup %1376 }
 0xc0e   :  { %v663_v55 = vmul.f32 2.0, %v1377_v54  ;;  %v665_v60 = vmul.f32 %v1377_v54, %v574_v42 }
 0xc10   :  { %v1137_v56 = vadd.f32 -1.0, %v663_v55 }
 0xc12   :  { %667 = vrot.lane.b32.xlu0 %v1137_v56, %s1400_s21 }
 0xc84   :  { %v668_v57 = vpop.permute.xlu0 %667 }
 0xc85   :  { %v670_v58 = vmul.f32 %v1377_v54, %v668_v57 }
 0xc87   :  { %672 = vrot.lane.b32.xlu1 %v670_v58, %s1400_s21 }
 0xcf9   :  { %v673_v61 = vpop.permute.xlu1 %672 }
 0xcfa   :  { %v675_v14 = vadd.f32 %v673_v61, %v665_v60  ;;  %v167_v60 = vadd.f32 %v1522_v16, %v1527_v18 }
 0xcfc   :  { %1378 = vtanh.f32 %v675_v14 }
 0xd09   :  { %v1379_v62 = vpop.eup %1378 }
 0xd0a   :  { %678 = vrot.lane.b32.xlu0 %v1379_v62, %s1400_s21 }
 0xd7c   :  { %v679_v63 = vpop.permute.xlu0 %678 }
 0xd7d   :  { %v681_v0 = vmul.f32 %v1377_v54, %v679_v63 }
 0xd7f   :  { %683 = vrot.lane.b32.xlu1 %v681_v0, %s1401_s2 }
 0xdf1   :  { %v684_v1 = vpop.permute.xlu1 %683 }
 0xdf2   :  { %1298 = vmatmul.mubr.msk.f32.vlgmr.msra.gmra.mxu1 %vm178_vm2, %v684_v1 }
 0xdf3   :  { %1312 = vmatpush3.msra.mxu1 %v1453_v4  ;;  %1319 = vmatprep.mubr.msk.f32.mxu1 %vm1399_vm1, %v1398_v6 }
 0xdf4   :  { %1313 = vmatprep.subr.mxu1 %v1398_v6 }
 0xdf5   :  { %1314 = vmatpush3.msra.mxu1 %v1470_v9 }
 0xdf6   :  { %1315 = vmatprep.subr.mxu1 %v1398_v6 }
 0xdf7   :  { %1316 = vmatpush3.msra.mxu1 %v1482_v11 }
 0xdf8   :  { %1317 = vmatprep.subr.mxu1 %v1398_v6 }
 0xdf9   :  { %1318 = vmatpush3.msra.mxu1 %v1491_v12 }
 0xeb2   :  { %v753_v3 = vpop.f32.mrf.mxu1 }
 0xeb3   :  { %v757_v4 = vadd.f32 %v753_v3, %v157_v2 }
 0xeb4   :  { %v1299_v5 = vpop.f32.mrf.mxu1 }
 0xeb5   :  { %v1139_v7 = vmul.f32 -1.442695, %v757_v4 }
 0xeb7   :  { %1380 = vpow2.f32 %v1139_v7 }
 0xec4   :  { %v1381_v8 = vpop.eup %1380 }
 0xec5   :  { %v761_v10 = vadd.f32 1.0, %v1381_v8 }
 0xec7   :  { %1382 = vrcp.f32 %v761_v10 }
 0xed4   :  { %v1383_v9 = vpop.eup %1382 }
 0xed5   :  { %v764_v15 = vmul.f32 2.0, %v1383_v9  ;;  %v766_v12 = vmul.f32 %v1383_v9, %v675_v14 }
 0xed7   :  { %v1140_v17 = vadd.f32 -1.0, %v764_v15 }
 0xed9   :  { %768 = vrot.lane.b32.xlu0 %v1140_v17, %s1400_s21 }
 0xf4b   :  { %v769_v11 = vpop.permute.xlu0 %768 }
 0xf4c   :  { %v771_v6 = vmul.f32 %v1383_v9, %v769_v11 }
 0xf4e   :  { %773 = vrot.lane.b32.xlu1 %v771_v6, %s1400_s21 }
 0xfc0   :  { %v774_v20 = vpop.permute.xlu1 %773 }
 0xfc1   :  { %v1636_v13 = vadd.f32 %v774_v20, %v766_v12 }
 0xfc3   :  { %1384 = vtanh.f32 %v1636_v13 }
 0xfd0   :  { %v1385_v22 = vpop.eup %1384 }
 0xfd1   :  { %779 = vrot.lane.b32.xlu0 %v1385_v22, %s1400_s21 }
0x1043   :  { %v780_v23 = vpop.permute.xlu0 %779 }
0x1044   :  { %v782_v24 = vmul.f32 %v1383_v9, %v780_v23 }
0x1046   :  { %784 = vrot.lane.b32.xlu1 %v782_v24, %s1401_s2 }
0x10b8   :  { %v785_v25 = vpop.permute.xlu1 %784 }
0x10b9   :  { %1309 = vmatmul.mubr.msk.f32.vlgmr.msra.gmra.mxu0 %vm178_vm2, %v785_v25 }
0x10ba   :  { %1323 = vmatpush3.msra.mxu0 %v177_v21  ;;  %1330 = vmatprep.mubr.msk.f32.mxu0 %vm178_vm2, %v1536_v38  ;;  %v162_v38 = vadd.f32 %v1527_v18, %v1529_v19 }
0x10bb   :  { %1324 = vmatprep.subr.mxu0 %v176_v27 }
0x10bc   :  { %1325 = vmatpush3.msra.mxu0 %v176_v27 }
0x10bd   :  { %1326 = vmatprep.subr.mxu0 %v175_v28 }
0x10be   :  { %1327 = vmatpush3.msra.mxu0 %v175_v28 }
0x10bf   :  { %1328 = vmatprep.subr.mxu0 %v174_v29 }
0x10c0   :  { %1329 = vmatpush3.msra.mxu0 %v174_v29 }
0x10c1   :  { %1331 = vmatmul.mubr.msk.f32.vlgmr.msra.gmra.mxu0 %vm178_vm2, %v1565_v59  ;;  %v1669_v59 = vld [vmem:[%s1730_s5] ss:$0 sm:$0xff] }
0x10c2   :  { %1333 = vmatprep.mubr.msk.f32.mxu0 %vm178_vm2, %v1584_v26 }
0x10c5   :  { %1334 = vmatmul.mubr.msk.f32.gmra.mxu0 %vm178_vm2, %v1603_v46 }
0x10c6   :  { %1336 = vmatprep.mubr.msk.f32.mxu0 %vm178_vm2, %v684_v1 }
0x10c9   :  { %1337 = vmatmul.mubr.msk.f32.gmra.mxu0 %vm178_vm2, %v785_v25 }
0x1179   :  { %v854_v30 = vpop.f32.mrf.mxu0 }
0x117a   :  { %v858_v31 = vadd.f32 %v854_v30, %v162_v38 }
0x117b   :  { %v1310_v32 = vpop.f32.mrf.mxu0 }
0x117c   :  { %v1142_v33 = vmul.f32 -1.442695, %v858_v31 }
0x117e   :  { %1386 = vpow2.f32 %v1142_v33 }
0x1181   :  { %v1332_v26 = vpop.f32.mrf.mxu0 }
0x1182   :  { %v1069_v34 = vadd.f32 %v1332_v26, %v1669_v59 }
0x1183   :  { %v1063_v35 = vpop.f32.mrf.mxu0 }
0x1184   :  { %1104 = vst.msk [vmem:[%s1731_s6 + $0x8] sm:$0xff] %vm1102_vm3, %v1069_v34  ;;  %v1064_v19 = vadd.f32 %v1669_v59, %v1063_v35 }
0x1185   :  { %v1335_v36 = vpop.f32.mrf.mxu0 }
0x1186   :  { %1103 = vst.msk [vmem:[%s1731_s6] sm:$0xff] %vm1102_vm3, %v1064_v19  ;;  %v1079_v37 = vadd.f32 %v1335_v36, %v1669_v59 }
0x1187   :  { %v1073_v39 = vpop.f32.mrf.mxu0 }
0x1188   :  { %1106 = vst.msk [vmem:[%s1731_s6 + $0x18] sm:$0xff] %vm1102_vm3, %v1079_v37  ;;  %v1074_v40 = vadd.f32 %v1669_v59, %v1073_v39 }
0x1189   :  { %v1338_v41 = vpop.f32.mrf.mxu0 }
0x118a   :  { %1105 = vst.msk [vmem:[%s1731_s6 + $0x10] sm:$0xff] %vm1102_vm3, %v1074_v40  ;;  %v1089_v42 = vadd.f32 %v1338_v41, %v1669_v59 }
0x118b   :  { %v1387_v43 = vpop.eup %1386  ;;  %v1083_v44 = vpop.f32.mrf.mxu0 }
0x118c   :  { %v862_v45 = vadd.f32 1.0, %v1387_v43  ;;  %1108 = vst.msk [vmem:[%s1731_s6 + $0x28] sm:$0xff] %vm1102_vm3, %v1089_v42  ;;  %v1084_v46 = vadd.f32 %v1669_v59, %v1083_v44 }
0x118e   :  { %1388 = vrcp.f32 %v862_v45  ;;  %1107 = vst.msk [vmem:[%s1731_s6 + $0x20] sm:$0xff] %vm1102_vm3, %v1084_v46 }
0x119b   :  { %v1389_v47 = vpop.eup %1388 }
0x119c   :  { %v865_v48 = vmul.f32 2.0, %v1389_v47  ;;  %v867_v52 = vmul.f32 %v1389_v47, %v1636_v13 }
0x119e   :  { %v1143_v49 = vadd.f32 -1.0, %v865_v48 }
0x11a0   :  { %869 = vrot.lane.b32.xlu0 %v1143_v49, %s1400_s21 }
0x1212   :  { %v870_v50 = vpop.permute.xlu0 %869 }
0x1213   :  { %v872_v51 = vmul.f32 %v1389_v47, %v870_v50 }
0x1215   :  { %874 = vrot.lane.b32.xlu1 %v872_v51, %s1400_s21 }
0x1287   :  { %v875_v53 = vpop.permute.xlu1 %874 }
0x1288   :  { %v877_v54 = vadd.f32 %v875_v53, %v867_v52 }
0x128a   :  { %1390 = vtanh.f32 %v877_v54 }
0x1297   :  { %v1391_v55 = vpop.eup %1390 }
0x1298   :  { %880 = vrot.lane.b32.xlu0 %v1391_v55, %s1400_s21 }
0x130a   :  { %v881_v56 = vpop.permute.xlu0 %880 }
0x130b   :  { %v883_v57 = vmul.f32 %v1389_v47, %v881_v56 }
0x130d   :  { %885 = vrot.lane.b32.xlu1 %v883_v57, %s1401_s2 }
0x137f   :  { %v886_v58 = vpop.permute.xlu1 %885 }
0x1380   :  { %1320 = vmatmul.mubr.msk.f32.vlgmr.msra.gmra.mxu1 %vm178_vm2, %v886_v58  ;;  %1339 = vmatprep.mubr.msk.f32.mxu0 %vm178_vm2, %v886_v58 }
0x1440   :  { %v955_v61 = vpop.f32.mrf.mxu1 }
0x1441   :  { %v959_v14 = vadd.f32 %v955_v61, %v167_v60 }
0x1442   :  { %v1321_v62 = vpop.f32.mrf.mxu1 }
0x1443   :  { %v1145_v63 = vmul.f32 -1.442695, %v959_v14 }
0x1445   :  { %1392 = vpow2.f32 %v1145_v63 }
0x1452   :  { %v1393_v0 = vpop.eup %1392 }
0x1453   :  { %v963_v1 = vadd.f32 1.0, %v1393_v0 }
0x1455   :  { %1394 = vrcp.f32 %v963_v1 }
0x1462   :  { %v1395_v2 = vpop.eup %1394 }
0x1463   :  { %v966_v3 = vmul.f32 2.0, %v1395_v2  ;;  %v968_v8 = vmul.f32 %v1395_v2, %v877_v54 }
0x1465   :  { %v1146_v4 = vadd.f32 -1.0, %v966_v3 }
0x1467   :  { %970 = vrot.lane.b32.xlu0 %v1146_v4, %s1400_s21 }
0x14d9   :  { %v971_v5 = vpop.permute.xlu0 %970 }
0x14da   :  { %v973_v7 = vmul.f32 %v1395_v2, %v971_v5 }
0x14dc   :  { %975 = vrot.lane.b32.xlu1 %v973_v7, %s1400_s21 }
0x154e   :  { %v976_v10 = vpop.permute.xlu1 %975 }
0x154f   :  { %v978_v16 = vadd.f32 %v976_v10, %v968_v8 }
0x1551   :  { %1396 = vtanh.f32 %v978_v16 }
0x155e   :  { %v1397_v18 = vpop.eup %1396 }
0x155f   :  { %981 = vrot.lane.b32.xlu0 %v1397_v18, %s1400_s21 }
0x15d1   :  { %v982_v9 = vpop.permute.xlu0 %981 }
0x15d2   :  { %v984_v15 = vmul.f32 %v1395_v2, %v982_v9 }
0x15d4   :  { %993 = vrot.lane.b32.xlu1 %v984_v15, %s1401_s2 }
0x1646   :  { %v994_v17 = vpop.permute.xlu1 %993 }
0x1647   :  { %1340 = vmatmul.mubr.msk.f32.gmra.mxu0 %vm178_vm2, %v994_v17 }
0x1707   :  { %v1341_v11 = vpop.f32.mrf.mxu0 }
0x1708   :  { %v1099_v6 = vadd.f32 %v1341_v11, %v1669_v59 }
0x1709   :  { %v1093_v12 = vpop.f32.mrf.mxu0 }
0x170a   :  { %1110 = vst.msk [vmem:[%s1731_s6 + $0x38] sm:$0xff] %vm1102_vm3, %v1099_v6  ;;  %v1094_v20 = vadd.f32 %v1669_v59, %v1093_v12 }
0x170c   :  { %1109 = vst.msk [vmem:[%s1731_s6 + $0x30] sm:$0xff] %vm1102_vm3, %v1094_v20 }

</bundles_post_ra>
